<compile_context>
chip_gen: v7x
topology: tpu7x:2x2x1
jax: 0.10.0
libtpu: 0.0.40
codegen_flags: <defaults>
</compile_context>

<pallas_src>
import jax
import jax.numpy as jnp
import numpy as np
from jax.experimental import pallas as pl
from jax.experimental.pallas import tpu as pltpu

LOG_STD_MAX = 2.0
LOG_STD_MIN = -5.0


def _round_up(v, m):
    return ((v + m - 1) // m) * m


def actor_kernel(x_ref, w1_ref, b1_ref, w2_ref, b2_ref, wh_ref, bh_ref,
                 mask_ref, out_ref):
    # fc1 + relu  (bf16 MXU inputs, f32 accumulate, f32 elementwise).
    # K = obs_dim (no K padding); the f32->bf16 cast of x happens here.
    h1 = jnp.dot(x_ref[...].astype(jnp.bfloat16), w1_ref[...],
                 preferred_element_type=jnp.float32) + b1_ref[...]
    h1 = jnp.maximum(h1, 0.0)

    # fc2 + relu
    h2 = jnp.dot(h1.astype(jnp.bfloat16), w2_ref[...],
                 preferred_element_type=jnp.float32) + b2_ref[...]
    h2 = jnp.maximum(h2, 0.0)

    # fused head: one matmul covers fc_mean and fc_logstd (lane-padded to 128)
    head = jnp.dot(h2.astype(jnp.bfloat16), wh_ref[...],
                   preferred_element_type=jnp.float32) + bh_ref[...]

    # lanes [0, act_dim)          -> mean (identity, mask = 0)
    # lanes [act_dim, 2*act_dim)  -> log_std = affine(tanh(.)), mask = 1
    squashed = LOG_STD_MIN + 0.5 * (LOG_STD_MAX - LOG_STD_MIN) * (jnp.tanh(head) + 1.0)
    mask = mask_ref[...]  # (1, head_pad) f32, broadcast over rows
    out_ref[...] = head + mask * (squashed - head)


def actor_forward(x, params, act_dim):
    """Actor.forward(x) -> (mean, log_std) via one Pallas kernel."""
    w1, b1, w2, b2, wh, bh, mask = params
    B, obs_dim = x.shape
    hidden = w1.shape[1]
    head_pad = wh.shape[1]
    x = x.astype(jnp.float32)

    # Batch tile: large enough (up to 512 rows) to amortize per-grid-step
    # overhead, but at least 2 grid steps once B > TB so the "parallel" batch
    # axis can be split across v7x's two TensorCores.  Weights/biases use
    # constant index_maps and stay VMEM-resident across grid steps.
    TB = max(8, min(512, _round_up(pl.cdiv(B, 2), 8)))
    grid = (pl.cdiv(B, TB),)

    out = pl.pallas_call(
        actor_kernel,
        out_shape=jax.ShapeDtypeStruct((B, head_pad), jnp.float32),
        grid=grid,
        in_specs=[
            pl.BlockSpec((TB, obs_dim), lambda i: (i, 0)),        # x tile (unpadded)
            pl.BlockSpec((obs_dim, hidden), lambda i: (0, 0)),    # w1 (resident)
            pl.BlockSpec((1, hidden), lambda i: (0, 0)),          # b1
            pl.BlockSpec((hidden, hidden), lambda i: (0, 0)),     # w2
            pl.BlockSpec((1, hidden), lambda i: (0, 0)),          # b2
            pl.BlockSpec((hidden, head_pad), lambda i: (0, 0)),   # fused head W
            pl.BlockSpec((1, head_pad), lambda i: (0, 0)),        # fused head b
            pl.BlockSpec((1, head_pad), lambda i: (0, 0)),        # log_std lane mask
        ],
        out_specs=pl.BlockSpec((TB, head_pad), lambda i: (i, 0)),
        compiler_params=pltpu.CompilerParams(
            dimension_semantics=("parallel",),
            vmem_limit_bytes=32 * 1024 * 1024,
        ),
    )(x, w1, b1, w2, b2, wh, bh, mask)

    mean = out[:, :act_dim]
    log_std = out[:, act_dim:2 * act_dim]
    return mean, log_std


def xavier_uniform(key, fan_in, fan_out):
    # Matches torch.nn.init.xavier_uniform_ on an (out, in) weight; we store
    # the transpose (in, out), which uses the same bound.
    bound = float(np.sqrt(6.0 / (fan_in + fan_out)))
    return jax.random.uniform(key, (fan_in, fan_out), jnp.float32,
                              minval=-bound, maxval=bound)


def init_actor_params(key, obs_dim, act_dim, hidden=256):
    """Build parameters already packed in the TPU-friendly layout."""
    head_pad = _round_up(2 * act_dim, 128)

    k1, k2, k3, k4 = jax.random.split(key, 4)
    w1 = xavier_uniform(k1, obs_dim, hidden)          # no K padding
    w2 = xavier_uniform(k2, hidden, hidden)
    wm = xavier_uniform(k3, hidden, act_dim)
    wl = xavier_uniform(k4, hidden, act_dim)

    # Fuse + lane-pad the two heads; weights bf16 (MXU native), biases f32.
    wh_p = (jnp.zeros((hidden, head_pad), jnp.float32)
            .at[:, :act_dim].set(wm)
            .at[:, act_dim:2 * act_dim].set(wl))

    w1_p = w1.astype(jnp.bfloat16)
    w2_p = w2.astype(jnp.bfloat16)
    wh_p = wh_p.astype(jnp.bfloat16)

    b1 = jnp.zeros((1, hidden), jnp.float32)
    b2 = jnp.zeros((1, hidden), jnp.float32)
    bh = jnp.zeros((1, head_pad), jnp.float32)

    # 1.0 on the log_std lanes [act_dim, 2*act_dim), 0.0 elsewhere.
    lane = np.arange(head_pad)
    mask = ((lane >= act_dim) & (lane < 2 * act_dim)).astype(np.float32)
    mask = jnp.asarray(mask).reshape(1, head_pad)

    return (w1_p, b1, w2_p, b2, wh_p, bh, mask)


def actor_forward_ref(x, params, act_dim):
    """Pure-JAX reference using the same packed bf16 params (same math)."""
    w1, b1, w2, b2, wh, bh, _ = params
    x = x.astype(jnp.float32)

    h = jnp.dot(x.astype(jnp.bfloat16), w1, preferred_element_type=jnp.float32) + b1
    h = jnp.maximum(h, 0.0)
    h = jnp.dot(h.astype(jnp.bfloat16), w2, preferred_element_type=jnp.float32) + b2
    h = jnp.maximum(h, 0.0)
    head = jnp.dot(h.astype(jnp.bfloat16), wh, preferred_element_type=jnp.float32) + bh

    mean = head[:, :act_dim]
    ls = jnp.tanh(head[:, act_dim:2 * act_dim])
    ls = LOG_STD_MIN + 0.5 * (LOG_STD_MAX - LOG_STD_MIN) * (ls + 1.0)
    return mean, ls


if __name__ == "__main__":
    # Small synthetic problem: observation_shape=(16,), action_shape=(4,)
    observation_shape = (16,)
    action_shape = (4,)
    obs_dim = int(np.prod(observation_shape))
    act_dim = int(np.prod(action_shape))
    batch = 8

    key = jax.random.PRNGKey(0)
    k_params, k_x = jax.random.split(key)
    params = init_actor_params(k_params, obs_dim, act_dim)
    x = jax.random.normal(k_x, (batch, obs_dim), jnp.float32)

    mean, log_std = actor_forward(x, params, act_dim)
    mean = jax.block_until_ready(mean)
    log_std = jax.block_until_ready(log_std)

    mean_ref, log_std_ref = actor_forward_ref(x, params, act_dim)
    np.testing.assert_allclose(np.asarray(mean), np.asarray(mean_ref),
                               rtol=1e-4, atol=1e-4)
    np.testing.assert_allclose(np.asarray(log_std), np.asarray(log_std_ref),
                               rtol=1e-4, atol=1e-4)

    assert mean.shape == (batch, act_dim) and log_std.shape == (batch, act_dim)
    assert float(jnp.min(log_std)) >= LOG_STD_MIN - 1e-4
    assert float(jnp.max(log_std)) <= LOG_STD_MAX + 1e-4

    print("KERNEL_OK")
</pallas_src>

<mosaic_0001>
module attributes {stable_mosaic.version = 11 : i64} {
  func.func @actor_kernel(%arg0: i32, %arg1: memref<8x16xf32, #tpu.memory_space<vmem>>, %arg2: memref<16x256xbf16, #tpu.memory_space<vmem>>, %arg3: memref<1x256xf32, #tpu.memory_space<vmem>>, %arg4: memref<256x256xbf16, #tpu.memory_space<vmem>>, %arg5: memref<1x256xf32, #tpu.memory_space<vmem>>, %arg6: memref<256x128xbf16, #tpu.memory_space<vmem>>, %arg7: memref<1x128xf32, #tpu.memory_space<vmem>>, %arg8: memref<1x128xf32, #tpu.memory_space<vmem>>, %arg9: memref<8x128xf32, #tpu.memory_space<vmem>>) attributes {dimension_semantics = [#tpu.dimension_semantics<parallel>], iteration_bounds = array<i64: 1>, scalar_prefetch = 0 : i64, scratch_operands = 0 : i64, tpu.core_type = #tpu.core_type<tc>, window_params = [{transform_indices = @transform_0, window_bounds = array<i64: 8, 16>}, {pipeline_mode = #tpu.pipeline_mode<synchronous>, transform_indices = @transform_1, window_bounds = array<i64: 16, 256>}, {pipeline_mode = #tpu.pipeline_mode<synchronous>, transform_indices = @transform_2, window_bounds = array<i64: 1, 256>}, {pipeline_mode = #tpu.pipeline_mode<synchronous>, transform_indices = @transform_3, window_bounds = array<i64: 256, 256>}, {pipeline_mode = #tpu.pipeline_mode<synchronous>, transform_indices = @transform_4, window_bounds = array<i64: 1, 256>}, {pipeline_mode = #tpu.pipeline_mode<synchronous>, transform_indices = @transform_5, window_bounds = array<i64: 256, 128>}, {pipeline_mode = #tpu.pipeline_mode<synchronous>, transform_indices = @transform_6, window_bounds = array<i64: 1, 128>}, {pipeline_mode = #tpu.pipeline_mode<synchronous>, transform_indices = @transform_7, window_bounds = array<i64: 1, 128>}, {transform_indices = @transform_8, window_bounds = array<i64: 8, 128>}]} {
    %c0 = arith.constant 0 : index
    %c0_0 = arith.constant 0 : index
    %0 = vector.load %arg1[%c0, %c0_0] : memref<8x16xf32, #tpu.memory_space<vmem>>, vector<8x16xf32>
    %1 = arith.truncf %0 : vector<8x16xf32> to vector<8x16xbf16>
    %c0_1 = arith.constant 0 : index
    %c0_2 = arith.constant 0 : index
    %2 = vector.load %arg2[%c0_1, %c0_2] : memref<16x256xbf16, #tpu.memory_space<vmem>>, vector<16x256xbf16>
    %cst = arith.constant dense<0.000000e+00> : vector<8x256xf32>
    %3 = tpu.matmul %1, %2, %cst {dimension_numbers = #tpu.dot_dimension_numbers<[1], [0], [0], [1], [0, 0, 1, 1], [], []>} : vector<8x16xbf16>, vector<16x256xbf16>, vector<8x256xf32> -> vector<8x256xf32>
    %c0_3 = arith.constant 0 : index
    %c0_4 = arith.constant 0 : index
    %4 = vector.load %arg3[%c0_3, %c0_4] : memref<1x256xf32, #tpu.memory_space<vmem>>, vector<1x256xf32>
    %5 = vector.broadcast %4 : vector<1x256xf32> to vector<8x256xf32>
    %6 = arith.addf %3, %5 : vector<8x256xf32>
    %cst_5 = arith.constant 0.000000e+00 : f32
    %7 = vector.broadcast %cst_5 : f32 to vector<8x256xf32>
    %8 = arith.maximumf %6, %7 : vector<8x256xf32>
    %9 = arith.truncf %8 : vector<8x256xf32> to vector<8x256xbf16>
    %c0_6 = arith.constant 0 : index
    %c0_7 = arith.constant 0 : index
    %10 = vector.load %arg4[%c0_6, %c0_7] : memref<256x256xbf16, #tpu.memory_space<vmem>>, vector<256x256xbf16>
    %cst_8 = arith.constant dense<0.000000e+00> : vector<8x256xf32>
    %11 = tpu.matmul %9, %10, %cst_8 {dimension_numbers = #tpu.dot_dimension_numbers<[1], [0], [0], [1], [0, 0, 1, 1], [], []>} : vector<8x256xbf16>, vector<256x256xbf16>, vector<8x256xf32> -> vector<8x256xf32>
    %c0_9 = arith.constant 0 : index
    %c0_10 = arith.constant 0 : index
    %12 = vector.load %arg5[%c0_9, %c0_10] : memref<1x256xf32, #tpu.memory_space<vmem>>, vector<1x256xf32>
    %13 = vector.broadcast %12 : vector<1x256xf32> to vector<8x256xf32>
    %14 = arith.addf %11, %13 : vector<8x256xf32>
    %cst_11 = arith.constant 0.000000e+00 : f32
    %15 = vector.broadcast %cst_11 : f32 to vector<8x256xf32>
    %16 = arith.maximumf %14, %15 : vector<8x256xf32>
    %17 = arith.truncf %16 : vector<8x256xf32> to vector<8x256xbf16>
    %c0_12 = arith.constant 0 : index
    %c0_13 = arith.constant 0 : index
    %18 = vector.load %arg6[%c0_12, %c0_13] : memref<256x128xbf16, #tpu.memory_space<vmem>>, vector<256x128xbf16>
    %cst_14 = arith.constant dense<0.000000e+00> : vector<8x128xf32>
    %19 = tpu.matmul %17, %18, %cst_14 {dimension_numbers = #tpu.dot_dimension_numbers<[1], [0], [0], [1], [0, 0, 1, 1], [], []>} : vector<8x256xbf16>, vector<256x128xbf16>, vector<8x128xf32> -> vector<8x128xf32>
    %c0_15 = arith.constant 0 : index
    %c0_16 = arith.constant 0 : index
    %20 = vector.load %arg7[%c0_15, %c0_16] : memref<1x128xf32, #tpu.memory_space<vmem>>, vector<1x128xf32>
    %21 = vector.broadcast %20 : vector<1x128xf32> to vector<8x128xf32>
    %22 = arith.addf %19, %21 : vector<8x128xf32>
    %23 = math.tanh %22 : vector<8x128xf32>
    %cst_17 = arith.constant 1.000000e+00 : f32
    %24 = vector.broadcast %cst_17 : f32 to vector<8x128xf32>
    %25 = arith.addf %23, %24 : vector<8x128xf32>
    %cst_18 = arith.constant 3.500000e+00 : f32
    %26 = vector.broadcast %cst_18 : f32 to vector<8x128xf32>
    %27 = arith.mulf %26, %25 : vector<8x128xf32>
    %cst_19 = arith.constant -5.000000e+00 : f32
    %28 = vector.broadcast %cst_19 : f32 to vector<8x128xf32>
    %29 = arith.addf %28, %27 : vector<8x128xf32>
    %c0_20 = arith.constant 0 : index
    %c0_21 = arith.constant 0 : index
    %30 = vector.load %arg8[%c0_20, %c0_21] : memref<1x128xf32, #tpu.memory_space<vmem>>, vector<1x128xf32>
    %31 = arith.subf %29, %22 : vector<8x128xf32>
    %32 = vector.broadcast %30 : vector<1x128xf32> to vector<8x128xf32>
    %33 = arith.mulf %32, %31 : vector<8x128xf32>
    %34 = arith.addf %22, %33 : vector<8x128xf32>
    %c0_22 = arith.constant 0 : index
    %c0_23 = arith.constant 0 : index
    %35 = vector.load %arg9[%c0_22, %c0_23] : memref<8x128xf32, #tpu.memory_space<vmem>>, vector<8x128xf32>
    tpu.vector_store %arg9[%c0_22, %c0_23], %34 {strides = array<i32>} : memref<8x128xf32, #tpu.memory_space<vmem>>, vector<8x128xf32>,
    return
  }
  func.func @transform_0(%arg0: i32) -> (i32, i32) {
    %c0_i32 = arith.constant 0 : i32
    %c0_i32_0 = arith.constant 0 : i32
    return %arg0, %c0_i32 : i32, i32
  }
  func.func @transform_1(%arg0: i32) -> (i32, i32) {
    %c0_i32 = arith.constant 0 : i32
    %c0_i32_0 = arith.constant 0 : i32
    %c0_i32_1 = arith.constant 0 : i32
    return %c0_i32, %c0_i32_0 : i32, i32
  }
  func.func @transform_2(%arg0: i32) -> (i32, i32) {
    %c0_i32 = arith.constant 0 : i32
    %c0_i32_0 = arith.constant 0 : i32
    %c0_i32_1 = arith.constant 0 : i32
    return %c0_i32, %c0_i32_0 : i32, i32
  }
  func.func @transform_3(%arg0: i32) -> (i32, i32) {
    %c0_i32 = arith.constant 0 : i32
    %c0_i32_0 = arith.constant 0 : i32
    %c0_i32_1 = arith.constant 0 : i32
    return %c0_i32, %c0_i32_0 : i32, i32
  }
  func.func @transform_4(%arg0: i32) -> (i32, i32) {
    %c0_i32 = arith.constant 0 : i32
    %c0_i32_0 = arith.constant 0 : i32
    %c0_i32_1 = arith.constant 0 : i32
    return %c0_i32, %c0_i32_0 : i32, i32
  }
  func.func @transform_5(%arg0: i32) -> (i32, i32) {
    %c0_i32 = arith.constant 0 : i32
    %c0_i32_0 = arith.constant 0 : i32
    %c0_i32_1 = arith.constant 0 : i32
    return %c0_i32, %c0_i32_0 : i32, i32
  }
  func.func @transform_6(%arg0: i32) -> (i32, i32) {
    %c0_i32 = arith.constant 0 : i32
    %c0_i32_0 = arith.constant 0 : i32
    %c0_i32_1 = arith.constant 0 : i32
    return %c0_i32, %c0_i32_0 : i32, i32
  }
  func.func @transform_7(%arg0: i32) -> (i32, i32) {
    %c0_i32 = arith.constant 0 : i32
    %c0_i32_0 = arith.constant 0 : i32
    %c0_i32_1 = arith.constant 0 : i32
    return %c0_i32, %c0_i32_0 : i32, i32
  }
  func.func @transform_8(%arg0: i32) -> (i32, i32) {
    %c0_i32 = arith.constant 0 : i32
    %c0_i32_0 = arith.constant 0 : i32
    return %arg0, %c0_i32 : i32, i32
  }
}

</mosaic_0001>

<bundles_post_ra>
// kernel: tpu_custom_call.1
= control target key start
LH: loop header
LB: loop body
LE: loop exit
PB: predicated region body
PF: predicated region fallthrough
CT: control target
= control target key end

     0   :  { %13 = vsyncpa [#allocation3], 0  ;;  %s1020_s0 = inlined_call_operand.hbm [shape: f32[8,16], index: 0, kind: input, shape index: {}]   ;;  %s1021_s1 = inlined_call_operand.hbm [shape: bf16[16,256], index: 1, kind: input, shape index: {}]   ;;  %s1022_s2 = inlined_call_operand.vmem [shape: f32[1,256], index: 2, kind: input, shape index: {}]   ;;  %s1023_s3 = inlined_call_operand.hbm [shape: bf16[256,256], index: 3, kind: input, shape index: {}]   ;;  %s1024_s4 = inlined_call_operand.vmem [shape: f32[1,256], index: 4, kind: input, shape index: {}]   ;;  %s1025_s5 = inlined_call_operand.hbm [shape: bf16[256,128], index: 5, kind: input, shape index: {}]   ;;  %s1026_s6 = inlined_call_operand.vmem [shape: f32[1,128], index: 6, kind: input, shape index: {}]   ;;  %s1027_s7 = inlined_call_operand.vmem [shape: f32[1,128], index: 7, kind: input, shape index: {}]   ;;  %s1028_s8 = inlined_call_operand.hbm [shape: f32[8,128], index: 8, kind: output, shape index: {}]  }
   0x1   :  { %14 = vsyncpa [#allocation6], 0 }
   0x2   :  { %15 = vsyncpa [#allocation9], 0 }
   0x3   :  { %16 = vsyncpa [#allocation4], 0  ;;  %s887_s27 = smov [#allocation5]   ;;  %s769_s9 = scalar_lea.hbm %s1021_s1, 256 }
   0x4   :  { %s32_s28 = sshll.u32 %s887_s27, 4  ;;  %p770_p0 = scmp.ne.s32.totalorder %s1021_s1, %s769_s9  ;;  %s33_s28 = int_to_ptr.vmem [resolvable:$true] %s32_s28 }
   0x5   :  { %p773_p1 = scmp.lt.u32.totalorder %s769_s9, %s1021_s1 }
   0x7   :  { %p775_p2 = pnand %p773_p1, %p770_p0 }
   0x9   :  { %778 = shalt.err (!%p775_p2)
}
   0xa   :  { %s779_s14 = scalar_lea.vmem %s33_s28, 256  ;;  %p784_p4 = scmp.lt.s32.totalorder %s33_s28, %s33_s28 }
   0xb   :  { %p780_p3 = scmp.ne.s32.totalorder %s33_s28, %s779_s14  ;;  %p785_p5 = scmp.lt.s32.totalorder %s779_s14, %s779_s14 }
   0xd   :  { %p786_p6 = por %p785_p5, %p784_p4 }
   0xf   :  { %p787_p7 = pnand %p786_p6, %p780_p3 }
  0x11   :  { %790 = shalt.err (!%p787_p7)
}
  0x12   :  { %s888_s15 = smov 128   ;;  %s889_s16 = smov 8  }
  0x13   :  { %38 = dma.hbm_to_vmem [thread:$0]  %s1021_s1, 256, %s33_s28, [#allocation6], %s888_s15, %s888_s15, %s889_s16  }
  0x14   :  { %s890_s19 = smov [#allocation2]   ;;  %s891_s21 = smov [#allocation7]  }
  0x15   :  { %s23_s20 = sshll.u32 %s890_s19, 4  ;;  %s46_s22 = sshll.u32 %s891_s21, 4  ;;  %s24_s20 = int_to_ptr.vmem [resolvable:$true] %s23_s20  ;;  %s47_s22 = int_to_ptr.vmem [resolvable:$true] %s46_s22 }
  0x16   :  { %s791_s25 = scalar_lea.hbm %s1020_s0, 128 }
  0x17   :  { %p792_p8 = scmp.ne.s32.totalorder %s1020_s0, %s791_s25  ;;  %p795_p9 = scmp.lt.u32.totalorder %s791_s25, %s1020_s0 }
  0x19   :  { %p797_p10 = pnand %p795_p9, %p792_p8 }
  0x1b   :  { %800 = shalt.err (!%p797_p10)
}
  0x1c   :  { %s801_s1 = scalar_lea.vmem %s24_s20, 128  ;;  %p806_p12 = scmp.lt.s32.totalorder %s24_s20, %s24_s20 }
  0x1d   :  { %p802_p11 = scmp.ne.s32.totalorder %s24_s20, %s801_s1  ;;  %p807_p13 = scmp.lt.s32.totalorder %s801_s1, %s801_s1 }
  0x1f   :  { %p808_p0 = por %p807_p13, %p806_p12 }
  0x21   :  { %p809_p1 = pnand %p808_p0, %p802_p11 }
  0x23   :  { %812 = shalt.err (!%p809_p1)
}
  0x24   :  { %26 = dma.hbm_to_vmem [thread:$0]  %s1020_s0, 128, %s24_s20, [#allocation3]  }
  0x25   :  { %s813_s12 = scalar_lea.hbm %s1023_s3, 4096 }
  0x26   :  { %p814_p2 = scmp.ne.s32.totalorder %s1023_s3, %s813_s12  ;;  %p817_p3 = scmp.lt.u32.totalorder %s813_s12, %s1023_s3 }
  0x28   :  { %p819_p4 = pnand %p817_p3, %p814_p2 }
  0x2a   :  { %822 = shalt.err (!%p819_p4)
}
  0x2b   :  { %s823_s19 = scalar_lea.vmem %s47_s22, 4096  ;;  %p828_p6 = scmp.lt.s32.totalorder %s47_s22, %s47_s22 }
  0x2c   :  { %p824_p5 = scmp.ne.s32.totalorder %s47_s22, %s823_s19  ;;  %p829_p7 = scmp.lt.s32.totalorder %s823_s19, %s823_s19 }
  0x2e   :  { %p830_p8 = por %p829_p7, %p828_p6 }
  0x30   :  { %p831_p9 = pnand %p830_p8, %p824_p5 }
  0x32   :  { %834 = shalt.err (!%p831_p9)
}
  0x33   :  { %52 = dma.hbm_to_vmem [thread:$0]  %s1023_s3, 4096, %s47_s22, [#allocation6], %s888_s15, %s888_s15, %s889_s16  }
  0x34   :  { %s892_s21 = smov [#allocation8]   ;;  %s835_s26 = scalar_lea.hbm %s1025_s5, 2048 }
  0x35   :  { %s60_s23 = sshll.u32 %s892_s21, 4  ;;  %p836_p10 = scmp.ne.s32.totalorder %s1025_s5, %s835_s26  ;;  %s61_s23 = int_to_ptr.vmem [resolvable:$true] %s60_s23 }
  0x36   :  { %p839_p11 = scmp.lt.u32.totalorder %s835_s26, %s1025_s5 }
  0x38   :  { %p841_p12 = pnand %p839_p11, %p836_p10 }
  0x3a   :  { %844 = shalt.err (!%p841_p12)
}
  0x3b   :  { %s845_s28 = scalar_lea.vmem %s61_s23, 2048  ;;  %p850_p0 = scmp.lt.s32.totalorder %s61_s23, %s61_s23 }
  0x3c   :  { %p846_p13 = scmp.ne.s32.totalorder %s61_s23, %s845_s28  ;;  %p851_p1 = scmp.lt.s32.totalorder %s845_s28, %s845_s28 }
  0x3e   :  { %p852_p2 = por %p851_p1, %p850_p0 }
  0x40   :  { %p853_p3 = pnand %p852_p2, %p846_p13 }
  0x42   :  { %856 = shalt.err (!%p853_p3)
}
  0x43   :  { %s893_s3 = smov 64   ;;  %s894_s15 = smov 4  }
  0x44   :  { %66 = dma.hbm_to_vmem [thread:$0]  %s1025_s5, 2048, %s61_s23, [#allocation9], %s893_s3, %s893_s3, %s894_s15  }
  0x45   :  { %879 = dma.done.wait [#allocation3], 128  }
  0x46   :  { %880 = vsyncadd [#allocation3], 4294967168 }
  0x47   :  { %881 = dma.done.wait [#allocation6], 4352  }
  0x48   :  { %882 = vsyncadd [#allocation6], 4294962944 }
  0x49   :  { %883 = dma.done.wait [#allocation9], 2048  }
  0x4a   :  { %884 = vsyncadd [#allocation9], 4294965248  ;;  %v895_v0 = vmov 0   ;;  %v700_v1 = vld [vmem:[#allocation5 + $0x4] ss:$8 sps:$4 sm:$0xff]   ;;  %v84_v3 = vld [vmem:[#allocation2] sm:$0xff]  ;;  %v90_v49 = vlaneseq }
  0x4b   :  { %146 = vmatprep.mubr.bf16.mxu0 %v895_v0  ;;  %v702_v2 = vld [vmem:[#allocation5] ss:$8 sps:$4 sm:$0xff]   ;;  %114 = vmatprep.subr.bf16.mxu0 %v700_v1  ;;  %v85_v4 = vpack.c.bf16 %v84_v3, %v84_v3  ;;  %v703_v5 = vld [vmem:[#allocation7 + $0x4] ss:$8 sps:$4 sm:$0xff]   ;;  %v705_v6 = vld [vmem:[#allocation7] ss:$8 sps:$4 sm:$0xff]  }
  0x4c   :  { %115 = vmatpush1.bf16.msra.mxu0 %v702_v2  ;;  %vm110_vm0 = vcmask 130048   ;;  %v706_v7 = vld [vmem:[#allocation7 + $0x14] ss:$8 sps:$4 sm:$0xff]   ;;  %363 = vmatprep.subr.bf16.mxu1 %v703_v5  ;;  %v708_v8 = vld [vmem:[#allocation7 + $0x10] ss:$8 sps:$4 sm:$0xff]   ;;  %v751_v37 = vld [vmem:[#allocation8 + $0x40] sm:$0xff]  }
  0x4d   :  { %364 = vmatpush1.bf16.msra.mxu1 %v705_v6  ;;  %v709_v9 = vld [vmem:[#allocation7 + $0x24] ss:$8 sps:$4 sm:$0xff]   ;;  %v711_v10 = vld [vmem:[#allocation7 + $0x20] ss:$8 sps:$4 sm:$0xff]   ;;  %v712_v11 = vld [vmem:[#allocation7 + $0x34] ss:$8 sps:$4 sm:$0xff]   ;;  %668 = vmatprep.subr.bf16.mxu0 %v751_v37 }
  0x4e   :  { %365 = vmatprep.subr.bf16.mxu1 %v706_v7  ;;  %v714_v12 = vld [vmem:[#allocation7 + $0x30] ss:$8 sps:$4 sm:$0xff]   ;;  %v715_v13 = vld [vmem:[#allocation7 + $0x44] ss:$8 sps:$4 sm:$0xff]   ;;  %v717_v14 = vld [vmem:[#allocation7 + $0x40] ss:$8 sps:$4 sm:$0xff]  }
  0x4f   :  { %617 = vmatmul.mubr.msk.bf16.vlgmr.msra.gmra.mrb[0].mxu0 %vm110_vm0, %v85_v4  ;;  %v718_v15 = vld [vmem:[#allocation7 + $0x54] ss:$8 sps:$4 sm:$0xff]   ;;  %v720_v16 = vld [vmem:[#allocation7 + $0x50] ss:$8 sps:$4 sm:$0xff]   ;;  %v721_v17 = vld [vmem:[#allocation7 + $0x64] ss:$8 sps:$4 sm:$0xff]  }
  0x50   :  { %v723_v18 = vld [vmem:[#allocation7 + $0x60] ss:$8 sps:$4 sm:$0xff]   ;;  %v724_v19 = vld [vmem:[#allocation7 + $0x74] ss:$8 sps:$4 sm:$0xff]   ;;  %v726_v20 = vld [vmem:[#allocation7 + $0x70] ss:$8 sps:$4 sm:$0xff]  }
  0x51   :  { %366 = vmatpush1.bf16.msra.mxu1 %v708_v8  ;;  %v727_v21 = vld [vmem:[#allocation7 + $0x84] ss:$8 sps:$4 sm:$0xff]   ;;  %v729_v22 = vld [vmem:[#allocation7 + $0x80] ss:$8 sps:$4 sm:$0xff]   ;;  %v730_v23 = vld [vmem:[#allocation7 + $0x94] ss:$8 sps:$4 sm:$0xff]  }
  0x52   :  { %367 = vmatprep.subr.bf16.mxu1 %v709_v9  ;;  %v732_v24 = vld [vmem:[#allocation7 + $0x90] ss:$8 sps:$4 sm:$0xff]   ;;  %v733_v25 = vld [vmem:[#allocation7 + $0xa4] ss:$8 sps:$4 sm:$0xff]   ;;  %v735_v26 = vld [vmem:[#allocation7 + $0xa0] ss:$8 sps:$4 sm:$0xff]  }
  0x53   :  { %v736_v27 = vld [vmem:[#allocation7 + $0xb4] ss:$8 sps:$4 sm:$0xff]   ;;  %v738_v28 = vld [vmem:[#allocation7 + $0xb0] ss:$8 sps:$4 sm:$0xff]   ;;  %v739_v29 = vld [vmem:[#allocation7 + $0xc4] ss:$8 sps:$4 sm:$0xff]  }
  0x54   :  { %v741_v30 = vld [vmem:[#allocation7 + $0xc0] ss:$8 sps:$4 sm:$0xff]   ;;  %v742_v31 = vld [vmem:[#allocation7 + $0xd4] ss:$8 sps:$4 sm:$0xff]   ;;  %v744_v32 = vld [vmem:[#allocation7 + $0xd0] ss:$8 sps:$4 sm:$0xff]  }
  0x55   :  { %368 = vmatpush1.bf16.msra.mxu1 %v711_v10  ;;  %v745_v33 = vld [vmem:[#allocation7 + $0xe4] ss:$8 sps:$4 sm:$0xff]   ;;  %v747_v34 = vld [vmem:[#allocation7 + $0xe0] ss:$8 sps:$4 sm:$0xff]   ;;  %v748_v35 = vld [vmem:[#allocation7 + $0xf4] ss:$8 sps:$4 sm:$0xff]  }
  0x56   :  { %369 = vmatprep.subr.bf16.mxu1 %v712_v11  ;;  %v750_v36 = vld [vmem:[#allocation7 + $0xf0] ss:$8 sps:$4 sm:$0xff]   ;;  %v752_v38 = vld [vmem:[#allocation8] sm:$0xff]   ;;  %v753_v39 = vld [vmem:[#allocation8 + $0x48] sm:$0xff]   ;;  %v91_v50 = vshrl.u32 %v90_v49, 7  ;;  %s896_s14 = smov [#allocation10]  }
  0x57   :  { %669 = vmatpush3.bf16.msra.mxu0 %v752_v38  ;;  %v754_v40 = vld [vmem:[#allocation8 + $0x8] sm:$0xff]   ;;  %v755_v41 = vld [vmem:[#allocation8 + $0x50] sm:$0xff]   ;;  %v757_v43 = vld [vmem:[#allocation8 + $0x58] sm:$0xff]   ;;  %s604_s17 = sshll.u32 %s896_s14, 4  ;;  %s605_s17 = int_to_ptr.vmem [resolvable:$true] %s604_s17 }
  0x58   :  { %670 = vmatprep.subr.bf16.mxu0 %v753_v39  ;;  %v756_v42 = vld [vmem:[#allocation8 + $0x10] sm:$0xff]   ;;  %v758_v44 = vld [vmem:[#allocation8 + $0x18] sm:$0xff]   ;;  %v759_v45 = vld [vmem:[#allocation8 + $0x60] sm:$0xff]   ;;  %v92_v51 = vsub.s32 0, %v91_v50  ;;  %v96_v53 = vsub.s32 1, %v91_v50  ;;  %p862_p5 = scmp.lt.s32.totalorder %s605_s17, %s605_s17 }
  0x59   :  { %370 = vmatpush1.bf16.msra.mxu1 %v714_v12  ;;  %v760_v46 = vld [vmem:[#allocation8 + $0x20] sm:$0xff]   ;;  %v761_v47 = vld [vmem:[#allocation8 + $0x68] sm:$0xff]   ;;  %v763_v2 = vld [vmem:[#allocation8 + $0x70] sm:$0xff]  }
  0x5a   :  { %371 = vmatprep.subr.bf16.mxu1 %v715_v13  ;;  %v762_v48 = vld [vmem:[#allocation8 + $0x28] sm:$0xff]   ;;  %v764_v3 = vld [vmem:[#allocation8 + $0x30] sm:$0xff]   ;;  %v765_v4 = vld [vmem:[#allocation8 + $0x78] sm:$0xff]  }
  0x5b   :  { %671 = vmatpush3.bf16.msra.mxu0 %v754_v40  ;;  %v88_v52 = vld [vmem:[%s1022_s2] sm:$0x3]  ;;  %v766_v5 = vld [vmem:[#allocation8 + $0x38] sm:$0xff]  }
  0x5c   :  { %672 = vmatprep.subr.bf16.mxu0 %v755_v41  ;;  %v93_v54 = vrot.slane %v88_v52, %v92_v51  ;;  %v97_v55 = vrot.slane %v88_v52, %v96_v53  ;;  %v191_v6 = vld [vmem:[%s1024_s4] sm:$0x3] }
  0x5d   :  { %372 = vmatpush1.bf16.msra.mxu1 %v717_v14  ;;  %v196_v7 = vrot.slane %v191_v6, %v92_v51  ;;  %v200_v8 = vrot.slane %v191_v6, %v96_v53 }
  0x5e   :  { %373 = vmatprep.subr.bf16.mxu1 %v718_v15 }
  0x5f   :  { %673 = vmatpush3.bf16.msra.mxu0 %v756_v42 }
  0x60   :  { %674 = vmatprep.subr.bf16.mxu0 %v757_v43 }
  0x61   :  { %374 = vmatpush1.bf16.msra.mxu1 %v720_v16 }
  0x62   :  { %375 = vmatprep.subr.bf16.mxu1 %v721_v17 }
  0x63   :  { %675 = vmatpush3.bf16.msra.mxu0 %v758_v44 }
  0x64   :  { %676 = vmatprep.subr.bf16.mxu0 %v759_v45 }
  0x65   :  { %376 = vmatpush1.bf16.msra.mxu1 %v723_v18 }
  0x66   :  { %377 = vmatprep.subr.bf16.mxu1 %v724_v19 }
  0x67   :  { %677 = vmatpush3.bf16.msra.mxu0 %v760_v46 }
  0x68   :  { %678 = vmatprep.subr.bf16.mxu0 %v761_v47 }
  0x69   :  { %378 = vmatpush1.bf16.msra.mxu1 %v726_v20  ;;  %v650_v20 = vld [vmem:[%s1026_s6] ss:$0 sm:$0xff]  ;;  %s857_s6 = scalar_lea.vmem %s605_s17, 128 }
  0x6a   :  { %379 = vmatprep.subr.bf16.mxu1 %v727_v21  ;;  %p858_p4 = scmp.ne.s32.totalorder %s605_s17, %s857_s6  ;;  %p863_p6 = scmp.lt.s32.totalorder %s857_s6, %s857_s6 }
  0x6b   :  { %679 = vmatpush3.bf16.msra.mxu0 %v762_v48 }
  0x6c   :  { %680 = vmatprep.subr.bf16.mxu0 %v763_v2  ;;  %p864_p7 = por %p863_p6, %p862_p5 }
  0x6d   :  { %380 = vmatpush1.bf16.msra.mxu1 %v729_v22 }
  0x6e   :  { %381 = vmatprep.subr.bf16.mxu1 %v730_v23  ;;  %p865_p8 = pnand %p864_p7, %p858_p4 }
  0x6f   :  { %681 = vmatpush3.bf16.msra.mxu0 %v764_v3 }
  0x70   :  { %682 = vmatprep.subr.bf16.mxu0 %v765_v4 }
  0x71   :  { %382 = vmatpush1.bf16.msra.mxu1 %v732_v24 }
  0x72   :  { %383 = vmatprep.subr.bf16.mxu1 %v733_v25 }
  0x73   :  { %683 = vmatpush3.bf16.msra.mxu0 %v766_v5 }
  0x75   :  { %384 = vmatpush1.bf16.msra.mxu1 %v735_v26 }
  0x76   :  { %385 = vmatprep.subr.bf16.mxu1 %v736_v27 }
  0x79   :  { %386 = vmatpush1.bf16.msra.mxu1 %v738_v28 }
  0x7a   :  { %387 = vmatprep.subr.bf16.mxu1 %v739_v29 }
  0x7d   :  { %388 = vmatpush1.bf16.msra.mxu1 %v741_v30  ;;  %v667_v30 = vld [vmem:[%s1027_s7] ss:$0 sm:$0xff] }
  0x7e   :  { %389 = vmatprep.subr.bf16.mxu1 %v742_v31 }
  0x81   :  { %390 = vmatpush1.bf16.msra.mxu1 %v744_v32 }
  0x82   :  { %391 = vmatprep.subr.bf16.mxu1 %v745_v33 }
  0x85   :  { %392 = vmatpush1.bf16.msra.mxu1 %v747_v34 }
  0x86   :  { %393 = vmatprep.subr.bf16.mxu1 %v748_v35 }
  0x89   :  { %394 = vmatpush1.bf16.msra.mxu1 %v750_v36 }
 0x122   :  { %v148_v56 = vpop.f32.mrb[0].mxu0 }
 0x123   :  { %v149_v57 = vadd.f32 %v148_v56, %v93_v54  ;;  %v150_v58 = vpop.f32.mrb[1].mxu0 }
 0x124   :  { %v151_v59 = vadd.f32 %v150_v58, %v97_v55  ;;  %v152_v60 = vpop.f32.mrb[2].mxu0 }
 0x125   :  { %v155_v61 = vmax.f32 %v149_v57, 0.0  ;;  %v153_v62 = vpop.f32.mrb[3].mxu0 }
 0x126   :  { %v156_v63 = vmax.f32 %v151_v59, 0.0 }
 0x127   :  { %v157_v1 = vpack.c.bf16 %v155_v61, %v155_v61 }
 0x128   :  { %v158_v0 = vpack.c.bf16 %v156_v63, %v156_v63 }
 0x12a   :  { %395 = vmatprep.mubr.bf16.mxu1 %v158_v0 }
 0x12b   :  { %396 = vmatmul.mubr.bf16.vlgmr.msra.gmra.mrb[0].mxu1 %v157_v1 }
 0x1fe   :  { %v397_v9 = vpop.f32.mrb[0].mxu1 }
 0x1ff   :  { %v398_v10 = vadd.f32 %v397_v9, %v196_v7  ;;  %v399_v11 = vpop.f32.mrb[1].mxu1 }
 0x200   :  { %v400_v12 = vadd.f32 %v399_v11, %v200_v8  ;;  %v401_v13 = vpop.f32.mrb[2].mxu1 }
 0x201   :  { %v404_v14 = vmax.f32 %v398_v10, 0.0  ;;  %v402_v15 = vpop.f32.mrb[3].mxu1 }
 0x202   :  { %v405_v16 = vmax.f32 %v400_v12, 0.0 }
 0x203   :  { %v406_v18 = vpack.c.bf16 %v404_v14, %v404_v14 }
 0x204   :  { %v407_v17 = vpack.c.bf16 %v405_v16, %v405_v16 }
 0x206   :  { %575 = vmatprep.mubr.bf16.mxu0 %v407_v17 }
 0x207   :  { %576 = vmatmul.mubr.bf16.vlgmr.msra.gmra.mrb[4].mxu0 %v406_v18 }
 0x2da   :  { %v684_v19 = vpop.f32.mrb[4].mxu0 }
 0x2db   :  { %v685_v21 = vpop.f32.mrb[5].mxu0 }
 0x2dc   :  { %v686_v22 = vadd.f32 %v685_v21, %v684_v19  ;;  %v687_v23 = vpop.f32.mrb[6].mxu0 }
 0x2dd   :  { %v688_v24 = vpop.f32.mrb[7].mxu0 }
 0x2de   :  { %v578_v25 = vadd.f32 %v686_v22, %v650_v20 }
 0x2e0   :  { %767 = vtanh.f32 %v578_v25 }
 0x2ea   :  { %v768_v26 = vpop.eup %767 }
 0x2eb   :  { %v584_v27 = vadd.f32 1.0, %v768_v26 }
 0x2ed   :  { %v585_v28 = vmul.f32 3.5, %v584_v27 }
 0x2ef   :  { %v586_v29 = vadd.f32 -5.0, %v585_v28 }
 0x2f1   :  { %v588_v31 = vsub.f32 %v586_v29, %v578_v25 }
 0x2f3   :  { %v595_v32 = vmul.f32 %v667_v30, %v588_v31 }
 0x2f5   :  { %v596_v33 = vadd.f32 %v595_v32, %v578_v25 }
 0x2f7   :  { %597 = vst [vmem:[#allocation10] sm:$0xff] %v596_v33 }
 0x2f8   :  { %868 = shalt.err (!%p865_p8)
}
 0x2f9   :  { %s869_s0 = scalar_lea.hbm %s1028_s8, 128 }
 0x2fa   :  { %p870_p9 = scmp.ne.s32.totalorder %s1028_s8, %s869_s0  ;;  %p873_p10 = scmp.lt.u32.totalorder %s869_s0, %s1028_s8 }
 0x2fc   :  { %p875_p11 = pnand %p873_p10, %p870_p9 }
 0x2fe   :  { %878 = shalt.err (!%p875_p11)
}
 0x2ff   :  { %607 = dma.vmem_to_hbm [thread:$0]  %s605_s17, 128, %s1028_s8, [#allocation4]  }
 0x300   :  { %885 = dma.done.wait [#allocation4], 128  }
 0x301   :  { %886 = vsyncadd [#allocation4], 4294967168 }
 0x302   :  { %611 = vsyncpa [#allocation3], 1 }
 0x303   :  { %612 = vsyncpa [#allocation6], 1 }
 0x304   :  { %613 = vsyncpa [#allocation9], 1 }
 0x305   :  { %614 = vsyncpa [#allocation4], 1 }

</bundles_post_ra>
